<compile_context>
chip_gen: v5e
topology: v5e:2x2
jax: 0.10.0
libtpu: 0.0.40
codegen_flags: <defaults>
</compile_context>

<pallas_src>
from functools import partial

import numpy as np
import jax
import jax.numpy as jnp
from jax.experimental import pallas as pl
from jax.experimental.pallas import tpu as pltpu

EPS = 1e-5


def _layernorm(v, w, b):
    mu = jnp.mean(v, axis=-1, keepdims=True)
    var = jnp.mean((v - mu) ** 2, axis=-1, keepdims=True)
    return (v - mu) * jax.lax.rsqrt(var + EPS) * w + b


def _gelu_tanh(x):
    # matches torch.nn.functional.gelu(x, approximate='tanh')
    c = 0.7978845608028654  # sqrt(2/pi)
    return 0.5 * x * (1.0 + jnp.tanh(c * (x + 0.044715 * x * x * x)))


def transformer_kernel(x_ref, mask_ref, ln_ref, wqkv_ref, wproj_ref, bproj_ref,
                       w1_ref, b1_ref, w2_ref, b2_ref, o_ref, x_vmem,
                       *, num_heads, compute_dtype):
    """One grid step == one full TransformerLayer applied to the whole batch.

    The running activation lives in `x_vmem` (f32) across grid iterations, so
    the HBM input is read once and the output is only written back at the end.
    """
    layer = pl.program_id(0)
    cdt = compute_dtype

    @pl.when(layer == 0)
    def _():
        x_vmem[...] = x_ref[...].astype(jnp.float32)

    x = x_vmem[...]                                    # (BN, C) f32
    bn, c = x.shape
    d = c // num_heads
    scale = float(d) ** -0.5

    ln = ln_ref[0].astype(jnp.float32)                 # (4, C): ln1w, ln1b, ln2w, ln2b

    # ----------------- attention block: x = x + proj(MHA(LN1(x))) -----------------
    h = _layernorm(x, ln[0:1, :], ln[1:2, :])
    # fused q/k/v projection: one (BN,C) x (C,3C) matmul, f32 accumulation
    qkv = jnp.dot(h.astype(cdt), wqkv_ref[0],
                  preferred_element_type=jnp.float32)  # (BN, 3C)
    q = qkv[:, :c] * scale                             # fold 1/sqrt(d) into q
    k = qkv[:, c:2 * c]
    v = qkv[:, 2 * c:]

    # head-major (H, BN, d) operands for the batched attention contractions
    qh = jnp.stack([q[:, i * d:(i + 1) * d] for i in range(num_heads)], axis=0).astype(cdt)
    kh = jnp.stack([k[:, i * d:(i + 1) * d] for i in range(num_heads)], axis=0).astype(cdt)
    vh = jnp.stack([v[:, i * d:(i + 1) * d] for i in range(num_heads)], axis=0).astype(cdt)

    # single head-batched score contraction (no per-head loop)
    s = jnp.einsum("hnd,hmd->hnm", qh, kh,
                   preferred_element_type=jnp.float32)      # (H, BN, BN)
    # additive block-diagonal mask: forbid attention across batch elements
    s = s + mask_ref[...][None, :, :]
    s = s - jnp.max(s, axis=-1, keepdims=True)
    p = jnp.exp(s)
    p = p * pl.reciprocal(jnp.sum(p, axis=-1, keepdims=True), approx=True)

    o = jnp.einsum("hnm,hmd->hnd", p.astype(cdt), vh,
                   preferred_element_type=jnp.float32)      # (H, BN, d)
    # output projection with head-blocked weight (H, d, C): batched matmul + sum
    proj = jnp.einsum("hnd,hdc->hnc", o.astype(cdt), wproj_ref[0],
                      preferred_element_type=jnp.float32)   # (H, BN, C)
    attn = jnp.sum(proj, axis=0) + bproj_ref[0].astype(jnp.float32)
    x = x + attn

    # ----------------- MLP block: x = x + fc2(gelu(fc1(LN2(x)))) -----------------
    h2 = _layernorm(x, ln[2:3, :], ln[3:4, :])
    m = jnp.dot(h2.astype(cdt), w1_ref[0],
                preferred_element_type=jnp.float32) + b1_ref[0].astype(jnp.float32)
    m = _gelu_tanh(m)
    m = jnp.dot(m.astype(cdt), w2_ref[0],
                preferred_element_type=jnp.float32) + b2_ref[0].astype(jnp.float32)
    x = x + m

    x_vmem[...] = x
    o_ref[...] = x.astype(o_ref.dtype)


def transformer_forward(x, layer_params, num_heads, compute_dtype=jnp.bfloat16):
    """Whole Transformer stack in a single pallas_call (grid over layers)."""
    B, N, C = x.shape
    L = len(layer_params)
    d = C // num_heads
    Hd = layer_params[0]["w1"].shape[-1]
    BN = B * N
    cdt = compute_dtype

    # ---- stack per-layer parameters (host side, done once per call) ----
    ln = jnp.stack([jnp.concatenate([p["ln1w"], p["ln1b"], p["ln2w"], p["ln2b"]],
                                    axis=0) for p in layer_params])          # (L,4,C) f32
    wqkv = jnp.stack([jnp.concatenate([p["wq"], p["wkv"]], axis=1)
                      for p in layer_params]).astype(cdt)                    # (L,C,3C)
    wproj = jnp.stack([p["wproj"].reshape(num_heads, d, C)
                       for p in layer_params]).astype(cdt)                   # (L,H,d,C)
    bproj = jnp.stack([p["bproj"] for p in layer_params])                    # (L,1,C) f32
    w1 = jnp.stack([p["w1"] for p in layer_params]).astype(cdt)              # (L,C,Hd)
    b1 = jnp.stack([p["b1"] for p in layer_params])                          # (L,1,Hd) f32
    w2 = jnp.stack([p["w2"] for p in layer_params]).astype(cdt)              # (L,Hd,C)
    b2 = jnp.stack([p["b2"] for p in layer_params])                          # (L,1,C) f32

    # additive mask keeping attention block-diagonal over the folded batch
    bid = jnp.repeat(jnp.arange(B), N)
    mask_add = jnp.where(bid[:, None] == bid[None, :], 0.0, -1e30).astype(jnp.float32)

    x2 = x.reshape(BN, C)   # fold batch*seq onto the sublane axis (free reshape)

    kernel = partial(transformer_kernel, num_heads=num_heads, compute_dtype=cdt)

    out = pl.pallas_call(
        kernel,
        out_shape=jax.ShapeDtypeStruct((BN, C), x.dtype),
        grid=(L,),
        in_specs=[
            pl.BlockSpec((BN, C), lambda l: (0, 0)),                  # x (loaded once)
            pl.BlockSpec((BN, BN), lambda l: (0, 0)),                 # batch mask
            pl.BlockSpec((1, 4, C), lambda l: (l, 0, 0)),             # LN params
            pl.BlockSpec((1, C, 3 * C), lambda l: (l, 0, 0)),         # fused qkv W
            pl.BlockSpec((1, num_heads, d, C), lambda l: (l, 0, 0, 0)),  # proj W (head-blocked)
            pl.BlockSpec((1, 1, C), lambda l: (l, 0, 0)),             # proj b
            pl.BlockSpec((1, C, Hd), lambda l: (l, 0, 0)),            # fc1 W
            pl.BlockSpec((1, 1, Hd), lambda l: (l, 0, 0)),            # fc1 b
            pl.BlockSpec((1, Hd, C), lambda l: (l, 0, 0)),            # fc2 W
            pl.BlockSpec((1, 1, C), lambda l: (l, 0, 0)),             # fc2 b
        ],
        out_specs=pl.BlockSpec((BN, C), lambda l: (0, 0)),
        scratch_shapes=[pltpu.VMEM((BN, C), jnp.float32)],            # resident activations
        # layer axis is a sequential dependency chain -> "arbitrary".
        # TODO(synk): on v7x (2 TCs) a leading "parallel" batch-split axis would
        # be worthwhile for realistic B*N; pointless at B*N=16.
        compiler_params=pltpu.CompilerParams(
            dimension_semantics=("arbitrary",)),
    )(x2, mask_add, ln, wqkv, wproj, bproj, w1, b1, w2, b2)
    return out.reshape(B, N, C)


# ----------------------- plain-JAX reference (for validation) ----------------
def ref_layer(x, p, num_heads):
    B, N, C = x.shape
    d = C // num_heads
    scale = float(d) ** -0.5

    def ln(v, w, b):
        mu = jnp.mean(v, -1, keepdims=True)
        var = jnp.mean((v - mu) ** 2, -1, keepdims=True)
        return (v - mu) * jax.lax.rsqrt(var + EPS) * w + b

    h = ln(x, p["ln1w"], p["ln1b"])
    q = (h @ p["wq"]).reshape(B, N, num_heads, d)
    kv = (h @ p["wkv"]).reshape(B, N, 2, num_heads, d)
    k, v = kv[:, :, 0], kv[:, :, 1]
    att = jnp.einsum("bnhd,bmhd->bnmh", q, k) * scale
    att = jax.nn.softmax(att, axis=2)
    out = jnp.einsum("bnmh,bmhd->bnhd", att, v).reshape(B, N, C)
    out = out @ p["wproj"] + p["bproj"]
    x = x + out
    h2 = ln(x, p["ln2w"], p["ln2b"])
    m = _gelu_tanh(h2 @ p["w1"] + p["b1"])
    m = m @ p["w2"] + p["b2"]
    return x + m


def ref_forward(x, layer_params, num_heads):
    for p in layer_params:
        x = ref_layer(x, p, num_heads)
    return x


# ----------------------------- parameter init --------------------------------
def init_layer_params(key, dim_self, mlp_ratio):
    C = dim_self
    H = int(dim_self * mlp_ratio)
    ks = jax.random.split(key, 6)
    s = 0.02
    return {
        "ln1w": jnp.ones((1, C), jnp.float32),
        "ln1b": jnp.zeros((1, C), jnp.float32),
        "wq": s * jax.random.normal(ks[0], (C, C), jnp.float32),
        "wkv": s * jax.random.normal(ks[1], (C, 2 * C), jnp.float32),
        "wproj": s * jax.random.normal(ks[2], (C, C), jnp.float32),
        "bproj": s * jax.random.normal(ks[3], (1, C), jnp.float32),
        "ln2w": jnp.ones((1, C), jnp.float32),
        "ln2b": jnp.zeros((1, C), jnp.float32),
        "w1": s * jax.random.normal(ks[4], (C, H), jnp.float32),
        "b1": jnp.zeros((1, H), jnp.float32),
        "w2": s * jax.random.normal(ks[5], (H, C), jnp.float32),
        "b2": jnp.zeros((1, C), jnp.float32),
    }


if __name__ == "__main__":
    # Transformer(dim_self=32, num_heads=4, num_layers=2, mlp_ratio=2.0)
    B, N, C = 2, 8, 32
    num_heads = 4
    num_layers = 2
    mlp_ratio = 2.0

    key = jax.random.PRNGKey(0)
    kx, *layer_keys = jax.random.split(key, num_layers + 1)
    x = jax.random.normal(kx, (B, N, C), jnp.float32)
    layer_params = [init_layer_params(k, C, mlp_ratio) for k in layer_keys]

    ref = jax.block_until_ready(ref_forward(x, layer_params, num_heads))

    # f32 matmul path (tight check; approx-reciprocal softmax denominator)
    out_f32 = jax.block_until_ready(
        transformer_forward(x, layer_params, num_heads, compute_dtype=jnp.float32))
    np.testing.assert_allclose(np.asarray(out_f32), np.asarray(ref),
                               rtol=5e-3, atol=5e-3)

    # default bf16-operand / f32-accumulate path (looser check)
    out_bf16 = jax.block_until_ready(
        transformer_forward(x, layer_params, num_heads, compute_dtype=jnp.bfloat16))
    np.testing.assert_allclose(np.asarray(out_bf16), np.asarray(ref),
                               rtol=3e-2, atol=3e-2)

    print("KERNEL_OK")
</pallas_src>

<mosaic_0001>
module attributes {stable_mosaic.version = 11 : i64} {
  func.func @transformer_kernel(%arg0: i32, %arg1: memref<16x32xf32, #tpu.memory_space<vmem>>, %arg2: memref<16x16xf32, #tpu.memory_space<vmem>>, %arg3: memref<1x4x32xf32, #tpu.memory_space<vmem>>, %arg4: memref<1x32x96xf32, #tpu.memory_space<vmem>>, %arg5: memref<1x4x8x32xf32, #tpu.memory_space<vmem>>, %arg6: memref<1x1x32xf32, #tpu.memory_space<vmem>>, %arg7: memref<1x32x64xf32, #tpu.memory_space<vmem>>, %arg8: memref<1x1x64xf32, #tpu.memory_space<vmem>>, %arg9: memref<1x64x32xf32, #tpu.memory_space<vmem>>, %arg10: memref<1x1x32xf32, #tpu.memory_space<vmem>>, %arg11: memref<16x32xf32, #tpu.memory_space<vmem>>, %arg12: memref<16x32xf32, #tpu.memory_space<vmem>>) attributes {dimension_semantics = [#tpu.dimension_semantics<arbitrary>], iteration_bounds = array<i64: 2>, scalar_prefetch = 0 : i64, scratch_operands = 1 : i64, tpu.core_type = #tpu.core_type<tc>, window_params = [{pipeline_mode = #tpu.pipeline_mode<synchronous>, transform_indices = @transform_0, window_bounds = array<i64: 16, 32>}, {pipeline_mode = #tpu.pipeline_mode<synchronous>, transform_indices = @transform_1, window_bounds = array<i64: 16, 16>}, {transform_indices = @transform_2, window_bounds = array<i64: 1, 4, 32>}, {transform_indices = @transform_3, window_bounds = array<i64: 1, 32, 96>}, {transform_indices = @transform_4, window_bounds = array<i64: 1, 4, 8, 32>}, {transform_indices = @transform_5, window_bounds = array<i64: 1, 1, 32>}, {transform_indices = @transform_6, window_bounds = array<i64: 1, 32, 64>}, {transform_indices = @transform_7, window_bounds = array<i64: 1, 1, 64>}, {transform_indices = @transform_8, window_bounds = array<i64: 1, 64, 32>}, {transform_indices = @transform_9, window_bounds = array<i64: 1, 1, 32>}, {pipeline_mode = #tpu.pipeline_mode<synchronous>, transform_indices = @transform_10, window_bounds = array<i64: 16, 32>}]} {
    %c0_i32 = arith.constant 0 : i32
    %0 = arith.cmpi eq, %arg0, %c0_i32 : i32
    %1 = arith.extui %0 : i1 to i32
    %c0_i32_0 = arith.constant 0 : i32
    %2 = arith.cmpi ne, %1, %c0_i32_0 : i32
    scf.if %2 {
      %c0_56 = arith.constant 0 : index
      %c0_57 = arith.constant 0 : index
      %144 = vector.load %arg1[%c0_56, %c0_57] : memref<16x32xf32, #tpu.memory_space<vmem>>, vector<16x32xf32>
      %c0_58 = arith.constant 0 : index
      %c0_59 = arith.constant 0 : index
      %145 = vector.load %arg12[%c0_58, %c0_59] : memref<16x32xf32, #tpu.memory_space<vmem>>, vector<16x32xf32>
      tpu.vector_store %arg12[%c0_58, %c0_59], %144 {strides = array<i32>} : memref<16x32xf32, #tpu.memory_space<vmem>>, vector<16x32xf32>,
    } else {
    }
    %c0 = arith.constant 0 : index
    %c0_1 = arith.constant 0 : index
    %3 = vector.load %arg12[%c0, %c0_1] : memref<16x32xf32, #tpu.memory_space<vmem>>, vector<16x32xf32>
    %c0_2 = arith.constant 0 : index
    %c0_3 = arith.constant 0 : index
    %c0_4 = arith.constant 0 : index
    %4 = vector.load %arg3[%c0_2, %c0_3, %c0_4] : memref<1x4x32xf32, #tpu.memory_space<vmem>>, vector<1x4x32xf32>
    %5 = vector.shape_cast %4 : vector<1x4x32xf32> to vector<4x32xf32>
    %6 = vector.extract_strided_slice %5 {offsets = [0, 0], sizes = [1, 32], strides = [1, 1]} : vector<4x32xf32> to vector<1x32xf32>
    %7 = vector.extract_strided_slice %5 {offsets = [1, 0], sizes = [1, 32], strides = [1, 1]} : vector<4x32xf32> to vector<1x32xf32>
    %cst = arith.constant dense<0.000000e+00> : vector<16xf32>
    %8 = vector.multi_reduction <add>, %3, %cst [1] : vector<16x32xf32> to vector<16xf32>
    %9 = vector.shape_cast %8 : vector<16xf32> to vector<16x1xf32>
    %cst_5 = arith.constant 3.200000e+01 : f32
    %10 = vector.broadcast %cst_5 : f32 to vector<16x1xf32>
    %11 = arith.divf %9, %10 : vector<16x1xf32>
    %12 = vector.broadcast %11 : vector<16x1xf32> to vector<16x32xf32>
    %13 = arith.subf %3, %12 : vector<16x32xf32>
    %14 = arith.mulf %13, %13 : vector<16x32xf32>
    %cst_6 = arith.constant dense<0.000000e+00> : vector<16xf32>
    %15 = vector.multi_reduction <add>, %14, %cst_6 [1] : vector<16x32xf32> to vector<16xf32>
    %16 = vector.shape_cast %15 : vector<16xf32> to vector<16x1xf32>
    %cst_7 = arith.constant 3.200000e+01 : f32
    %17 = vector.broadcast %cst_7 : f32 to vector<16x1xf32>
    %18 = arith.divf %16, %17 : vector<16x1xf32>
    %19 = vector.broadcast %11 : vector<16x1xf32> to vector<16x32xf32>
    %20 = arith.subf %3, %19 : vector<16x32xf32>
    %cst_8 = arith.constant 9.99999974E-6 : f32
    %21 = vector.broadcast %cst_8 : f32 to vector<16x1xf32>
    %22 = arith.addf %18, %21 : vector<16x1xf32>
    %23 = math.rsqrt %22 : vector<16x1xf32>
    %24 = vector.broadcast %23 : vector<16x1xf32> to vector<16x32xf32>
    %25 = arith.mulf %20, %24 : vector<16x32xf32>
    %26 = vector.broadcast %6 : vector<1x32xf32> to vector<16x32xf32>
    %27 = arith.mulf %25, %26 : vector<16x32xf32>
    %28 = vector.broadcast %7 : vector<1x32xf32> to vector<16x32xf32>
    %29 = arith.addf %27, %28 : vector<16x32xf32>
    %c0_9 = arith.constant 0 : index
    %c0_10 = arith.constant 0 : index
    %c0_11 = arith.constant 0 : index
    %30 = vector.load %arg4[%c0_9, %c0_10, %c0_11] : memref<1x32x96xf32, #tpu.memory_space<vmem>>, vector<1x32x96xf32>
    %31 = vector.shape_cast %30 : vector<1x32x96xf32> to vector<32x96xf32>
    %cst_12 = arith.constant dense<0.000000e+00> : vector<16x96xf32>
    %32 = tpu.matmul %29, %31, %cst_12 {dimension_numbers = #tpu.dot_dimension_numbers<[1], [0], [0], [1], [0, 0, 1, 1], [], []>} : vector<16x32xf32>, vector<32x96xf32>, vector<16x96xf32> -> vector<16x96xf32>
    %33 = vector.extract_strided_slice %32 {offsets = [0, 0], sizes = [16, 32], strides = [1, 1]} : vector<16x96xf32> to vector<16x32xf32>
    %cst_13 = arith.constant 0.353553385 : f32
    %34 = vector.broadcast %cst_13 : f32 to vector<16x32xf32>
    %35 = arith.mulf %33, %34 : vector<16x32xf32>
    %36 = vector.extract_strided_slice %32 {offsets = [0, 32], sizes = [16, 32], strides = [1, 1]} : vector<16x96xf32> to vector<16x32xf32>
    %37 = vector.extract_strided_slice %32 {offsets = [0, 64], sizes = [16, 32], strides = [1, 1]} : vector<16x96xf32> to vector<16x32xf32>
    %38 = vector.extract_strided_slice %35 {offsets = [0, 0], sizes = [16, 8], strides = [1, 1]} : vector<16x32xf32> to vector<16x8xf32>
    %39 = vector.extract_strided_slice %35 {offsets = [0, 8], sizes = [16, 8], strides = [1, 1]} : vector<16x32xf32> to vector<16x8xf32>
    %40 = vector.extract_strided_slice %35 {offsets = [0, 16], sizes = [16, 8], strides = [1, 1]} : vector<16x32xf32> to vector<16x8xf32>
    %41 = vector.extract_strided_slice %35 {offsets = [0, 24], sizes = [16, 8], strides = [1, 1]} : vector<16x32xf32> to vector<16x8xf32>
    %42 = vector.shape_cast %38 : vector<16x8xf32> to vector<1x16x8xf32>
    %43 = vector.shape_cast %39 : vector<16x8xf32> to vector<1x16x8xf32>
    %44 = vector.shape_cast %40 : vector<16x8xf32> to vector<1x16x8xf32>
    %45 = vector.shape_cast %41 : vector<16x8xf32> to vector<1x16x8xf32>
    %46 = tpu.concatenate %42, %43, %44, %45 in 0 : vector<1x16x8xf32>, vector<1x16x8xf32>, vector<1x16x8xf32>, vector<1x16x8xf32> -> vector<4x16x8xf32>
    %47 = vector.extract_strided_slice %36 {offsets = [0, 0], sizes = [16, 8], strides = [1, 1]} : vector<16x32xf32> to vector<16x8xf32>
    %48 = vector.extract_strided_slice %36 {offsets = [0, 8], sizes = [16, 8], strides = [1, 1]} : vector<16x32xf32> to vector<16x8xf32>
    %49 = vector.extract_strided_slice %36 {offsets = [0, 16], sizes = [16, 8], strides = [1, 1]} : vector<16x32xf32> to vector<16x8xf32>
    %50 = vector.extract_strided_slice %36 {offsets = [0, 24], sizes = [16, 8], strides = [1, 1]} : vector<16x32xf32> to vector<16x8xf32>
    %51 = vector.shape_cast %47 : vector<16x8xf32> to vector<1x16x8xf32>
    %52 = vector.shape_cast %48 : vector<16x8xf32> to vector<1x16x8xf32>
    %53 = vector.shape_cast %49 : vector<16x8xf32> to vector<1x16x8xf32>
    %54 = vector.shape_cast %50 : vector<16x8xf32> to vector<1x16x8xf32>
    %55 = tpu.concatenate %51, %52, %53, %54 in 0 : vector<1x16x8xf32>, vector<1x16x8xf32>, vector<1x16x8xf32>, vector<1x16x8xf32> -> vector<4x16x8xf32>
    %56 = vector.extract_strided_slice %37 {offsets = [0, 0], sizes = [16, 8], strides = [1, 1]} : vector<16x32xf32> to vector<16x8xf32>
    %57 = vector.extract_strided_slice %37 {offsets = [0, 8], sizes = [16, 8], strides = [1, 1]} : vector<16x32xf32> to vector<16x8xf32>
    %58 = vector.extract_strided_slice %37 {offsets = [0, 16], sizes = [16, 8], strides = [1, 1]} : vector<16x32xf32> to vector<16x8xf32>
    %59 = vector.extract_strided_slice %37 {offsets = [0, 24], sizes = [16, 8], strides = [1, 1]} : vector<16x32xf32> to vector<16x8xf32>
    %60 = vector.shape_cast %56 : vector<16x8xf32> to vector<1x16x8xf32>
    %61 = vector.shape_cast %57 : vector<16x8xf32> to vector<1x16x8xf32>
    %62 = vector.shape_cast %58 : vector<16x8xf32> to vector<1x16x8xf32>
    %63 = vector.shape_cast %59 : vector<16x8xf32> to vector<1x16x8xf32>
    %64 = tpu.concatenate %60, %61, %62, %63 in 0 : vector<1x16x8xf32>, vector<1x16x8xf32>, vector<1x16x8xf32>, vector<1x16x8xf32> -> vector<4x16x8xf32>
    "tpu.trace_start"() <{level = 10 : i32, message = "hnd,hmd->hnm"}> : () -> ()
    %cst_14 = arith.constant dense<0.000000e+00> : vector<4x16x16xf32>
    %65 = tpu.matmul %46, %55, %cst_14 {dimension_numbers = #tpu.dot_dimension_numbers<[2], [2], [1], [1], [0, 0, 0, 1, 1, 1], [0], [0]>} : vector<4x16x8xf32>, vector<4x16x8xf32>, vector<4x16x16xf32> -> vector<4x16x16xf32>
    "tpu.trace_stop"() : () -> ()
    %c0_15 = arith.constant 0 : index
    %c0_16 = arith.constant 0 : index
    %66 = vector.load %arg2[%c0_15, %c0_16] : memref<16x16xf32, #tpu.memory_space<vmem>>, vector<16x16xf32>
    %67 = vector.shape_cast %66 : vector<16x16xf32> to vector<1x16x16xf32>
    %68 = vector.broadcast %67 : vector<1x16x16xf32> to vector<4x16x16xf32>
    %69 = arith.addf %65, %68 : vector<4x16x16xf32>
    %cst_17 = arith.constant dense<0xFF800000> : vector<4x16xf32>
    %70 = vector.multi_reduction <maximumf>, %69, %cst_17 [2] : vector<4x16x16xf32> to vector<4x16xf32>
    %71 = vector.shape_cast %70 : vector<4x16xf32> to vector<4x16x1xf32>
    %72 = vector.broadcast %71 : vector<4x16x1xf32> to vector<4x16x16xf32>
    %73 = arith.subf %69, %72 : vector<4x16x16xf32>
    %74 = math.exp %73 : vector<4x16x16xf32>
    %cst_18 = arith.constant dense<0.000000e+00> : vector<4x16xf32>
    %75 = vector.multi_reduction <add>, %74, %cst_18 [2] : vector<4x16x16xf32> to vector<4x16xf32>
    %76 = vector.shape_cast %75 : vector<4x16xf32> to vector<4x16x1xf32>
    %77 = tpu.reciprocal %76 {approx = true} : vector<4x16x1xf32> -> vector<4x16x1xf32>
    %78 = vector.broadcast %77 : vector<4x16x1xf32> to vector<4x16x16xf32>
    %79 = arith.mulf %74, %78 : vector<4x16x16xf32>
    "tpu.trace_start"() <{level = 10 : i32, message = "hnm,hmd->hnd"}> : () -> ()
    %cst_19 = arith.constant dense<0.000000e+00> : vector<4x16x8xf32>
    %80 = tpu.matmul %79, %64, %cst_19 {dimension_numbers = #tpu.dot_dimension_numbers<[2], [1], [1], [2], [0, 0, 0, 1, 1, 2], [0], [0]>} : vector<4x16x16xf32>, vector<4x16x8xf32>, vector<4x16x8xf32> -> vector<4x16x8xf32>
    "tpu.trace_stop"() : () -> ()
    %c0_20 = arith.constant 0 : index
    %c0_21 = arith.constant 0 : index
    %c0_22 = arith.constant 0 : index
    %c0_23 = arith.constant 0 : index
    %81 = vector.load %arg5[%c0_20, %c0_21, %c0_22, %c0_23] : memref<1x4x8x32xf32, #tpu.memory_space<vmem>>, vector<1x4x8x32xf32>
    %82 = vector.shape_cast %81 : vector<1x4x8x32xf32> to vector<4x8x32xf32>
    "tpu.trace_start"() <{level = 10 : i32, message = "hnd,hdc->hnc"}> : () -> ()
    %cst_24 = arith.constant dense<0.000000e+00> : vector<4x16x32xf32>
    %83 = tpu.matmul %80, %82, %cst_24 {dimension_numbers = #tpu.dot_dimension_numbers<[2], [1], [1], [2], [0, 0, 0, 1, 1, 2], [0], [0]>} : vector<4x16x8xf32>, vector<4x8x32xf32>, vector<4x16x32xf32> -> vector<4x16x32xf32>
    "tpu.trace_stop"() : () -> ()
    %cst_25 = arith.constant dense<0.000000e+00> : vector<16x32xf32>
    %84 = vector.multi_reduction <add>, %83, %cst_25 [0] : vector<4x16x32xf32> to vector<16x32xf32>
    %c0_26 = arith.constant 0 : index
    %c0_27 = arith.constant 0 : index
    %c0_28 = arith.constant 0 : index
    %85 = vector.load %arg6[%c0_26, %c0_27, %c0_28] : memref<1x1x32xf32, #tpu.memory_space<vmem>>, vector<1x1x32xf32>
    %86 = vector.shape_cast %85 : vector<1x1x32xf32> to vector<1x32xf32>
    %87 = vector.broadcast %86 : vector<1x32xf32> to vector<16x32xf32>
    %88 = arith.addf %84, %87 : vector<16x32xf32>
    %89 = arith.addf %3, %88 : vector<16x32xf32>
    %90 = vector.extract_strided_slice %5 {offsets = [2, 0], sizes = [1, 32], strides = [1, 1]} : vector<4x32xf32> to vector<1x32xf32>
    %91 = vector.extract_strided_slice %5 {offsets = [3, 0], sizes = [1, 32], strides = [1, 1]} : vector<4x32xf32> to vector<1x32xf32>
    %cst_29 = arith.constant dense<0.000000e+00> : vector<16xf32>
    %92 = vector.multi_reduction <add>, %89, %cst_29 [1] : vector<16x32xf32> to vector<16xf32>
    %93 = vector.shape_cast %92 : vector<16xf32> to vector<16x1xf32>
    %cst_30 = arith.constant 3.200000e+01 : f32
    %94 = vector.broadcast %cst_30 : f32 to vector<16x1xf32>
    %95 = arith.divf %93, %94 : vector<16x1xf32>
    %96 = vector.broadcast %95 : vector<16x1xf32> to vector<16x32xf32>
    %97 = arith.subf %89, %96 : vector<16x32xf32>
    %98 = arith.mulf %97, %97 : vector<16x32xf32>
    %cst_31 = arith.constant dense<0.000000e+00> : vector<16xf32>
    %99 = vector.multi_reduction <add>, %98, %cst_31 [1] : vector<16x32xf32> to vector<16xf32>
    %100 = vector.shape_cast %99 : vector<16xf32> to vector<16x1xf32>
    %cst_32 = arith.constant 3.200000e+01 : f32
    %101 = vector.broadcast %cst_32 : f32 to vector<16x1xf32>
    %102 = arith.divf %100, %101 : vector<16x1xf32>
    %103 = vector.broadcast %95 : vector<16x1xf32> to vector<16x32xf32>
    %104 = arith.subf %89, %103 : vector<16x32xf32>
    %cst_33 = arith.constant 9.99999974E-6 : f32
    %105 = vector.broadcast %cst_33 : f32 to vector<16x1xf32>
    %106 = arith.addf %102, %105 : vector<16x1xf32>
    %107 = math.rsqrt %106 : vector<16x1xf32>
    %108 = vector.broadcast %107 : vector<16x1xf32> to vector<16x32xf32>
    %109 = arith.mulf %104, %108 : vector<16x32xf32>
    %110 = vector.broadcast %90 : vector<1x32xf32> to vector<16x32xf32>
    %111 = arith.mulf %109, %110 : vector<16x32xf32>
    %112 = vector.broadcast %91 : vector<1x32xf32> to vector<16x32xf32>
    %113 = arith.addf %111, %112 : vector<16x32xf32>
    %c0_34 = arith.constant 0 : index
    %c0_35 = arith.constant 0 : index
    %c0_36 = arith.constant 0 : index
    %114 = vector.load %arg7[%c0_34, %c0_35, %c0_36] : memref<1x32x64xf32, #tpu.memory_space<vmem>>, vector<1x32x64xf32>
    %115 = vector.shape_cast %114 : vector<1x32x64xf32> to vector<32x64xf32>
    %cst_37 = arith.constant dense<0.000000e+00> : vector<16x64xf32>
    %116 = tpu.matmul %113, %115, %cst_37 {dimension_numbers = #tpu.dot_dimension_numbers<[1], [0], [0], [1], [0, 0, 1, 1], [], []>} : vector<16x32xf32>, vector<32x64xf32>, vector<16x64xf32> -> vector<16x64xf32>
    %c0_38 = arith.constant 0 : index
    %c0_39 = arith.constant 0 : index
    %c0_40 = arith.constant 0 : index
    %117 = vector.load %arg8[%c0_38, %c0_39, %c0_40] : memref<1x1x64xf32, #tpu.memory_space<vmem>>, vector<1x1x64xf32>
    %118 = vector.shape_cast %117 : vector<1x1x64xf32> to vector<1x64xf32>
    %119 = vector.broadcast %118 : vector<1x64xf32> to vector<16x64xf32>
    %120 = arith.addf %116, %119 : vector<16x64xf32>
    %cst_41 = arith.constant 5.000000e-01 : f32
    %121 = vector.broadcast %cst_41 : f32 to vector<16x64xf32>
    %122 = arith.mulf %121, %120 : vector<16x64xf32>
    %cst_42 = arith.constant 4.471500e-02 : f32
    %123 = vector.broadcast %cst_42 : f32 to vector<16x64xf32>
    %124 = arith.mulf %123, %120 : vector<16x64xf32>
    %125 = arith.mulf %124, %120 : vector<16x64xf32>
    %126 = arith.mulf %125, %120 : vector<16x64xf32>
    %127 = arith.addf %120, %126 : vector<16x64xf32>
    %cst_43 = arith.constant 0.797884583 : f32
    %128 = vector.broadcast %cst_43 : f32 to vector<16x64xf32>
    %129 = arith.mulf %128, %127 : vector<16x64xf32>
    %130 = math.tanh %129 : vector<16x64xf32>
    %cst_44 = arith.constant 1.000000e+00 : f32
    %131 = vector.broadcast %cst_44 : f32 to vector<16x64xf32>
    %132 = arith.addf %131, %130 : vector<16x64xf32>
    %133 = arith.mulf %122, %132 : vector<16x64xf32>
    %c0_45 = arith.constant 0 : index
    %c0_46 = arith.constant 0 : index
    %c0_47 = arith.constant 0 : index
    %134 = vector.load %arg9[%c0_45, %c0_46, %c0_47] : memref<1x64x32xf32, #tpu.memory_space<vmem>>, vector<1x64x32xf32>
    %135 = vector.shape_cast %134 : vector<1x64x32xf32> to vector<64x32xf32>
    %cst_48 = arith.constant dense<0.000000e+00> : vector<16x32xf32>
    %136 = tpu.matmul %133, %135, %cst_48 {dimension_numbers = #tpu.dot_dimension_numbers<[1], [0], [0], [1], [0, 0, 1, 1], [], []>} : vector<16x64xf32>, vector<64x32xf32>, vector<16x32xf32> -> vector<16x32xf32>
    %c0_49 = arith.constant 0 : index
    %c0_50 = arith.constant 0 : index
    %c0_51 = arith.constant 0 : index
    %137 = vector.load %arg10[%c0_49, %c0_50, %c0_51] : memref<1x1x32xf32, #tpu.memory_space<vmem>>, vector<1x1x32xf32>
    %138 = vector.shape_cast %137 : vector<1x1x32xf32> to vector<1x32xf32>
    %139 = vector.broadcast %138 : vector<1x32xf32> to vector<16x32xf32>
    %140 = arith.addf %136, %139 : vector<16x32xf32>
    %141 = arith.addf %89, %140 : vector<16x32xf32>
    %c0_52 = arith.constant 0 : index
    %c0_53 = arith.constant 0 : index
    %142 = vector.load %arg12[%c0_52, %c0_53] : memref<16x32xf32, #tpu.memory_space<vmem>>, vector<16x32xf32>
    tpu.vector_store %arg12[%c0_52, %c0_53], %141 {strides = array<i32>} : memref<16x32xf32, #tpu.memory_space<vmem>>, vector<16x32xf32>,
    %c0_54 = arith.constant 0 : index
    %c0_55 = arith.constant 0 : index
    %143 = vector.load %arg11[%c0_54, %c0_55] : memref<16x32xf32, #tpu.memory_space<vmem>>, vector<16x32xf32>
    tpu.vector_store %arg11[%c0_54, %c0_55], %141 {strides = array<i32>} : memref<16x32xf32, #tpu.memory_space<vmem>>, vector<16x32xf32>,
    return
  }
  func.func @transform_0(%arg0: i32) -> (i32, i32) {
    %c0_i32 = arith.constant 0 : i32
    %c0_i32_0 = arith.constant 0 : i32
    %c0_i32_1 = arith.constant 0 : i32
    return %c0_i32, %c0_i32_0 : i32, i32
  }
  func.func @transform_1(%arg0: i32) -> (i32, i32) {
    %c0_i32 = arith.constant 0 : i32
    %c0_i32_0 = arith.constant 0 : i32
    %c0_i32_1 = arith.constant 0 : i32
    return %c0_i32, %c0_i32_0 : i32, i32
  }
  func.func @transform_2(%arg0: i32) -> (i32, i32, i32) {
    %c0_i32 = arith.constant 0 : i32
    %c0_i32_0 = arith.constant 0 : i32
    %c0_i32_1 = arith.constant 0 : i32
    return %arg0, %c0_i32, %c0_i32_0 : i32, i32, i32
  }
  func.func @transform_3(%arg0: i32) -> (i32, i32, i32) {
    %c0_i32 = arith.constant 0 : i32
    %c0_i32_0 = arith.constant 0 : i32
    %c0_i32_1 = arith.constant 0 : i32
    return %arg0, %c0_i32, %c0_i32_0 : i32, i32, i32
  }
  func.func @transform_4(%arg0: i32) -> (i32, i32, i32, i32) {
    %c0_i32 = arith.constant 0 : i32
    %c0_i32_0 = arith.constant 0 : i32
    %c0_i32_1 = arith.constant 0 : i32
    %c0_i32_2 = arith.constant 0 : i32
    return %arg0, %c0_i32, %c0_i32_0, %c0_i32_1 : i32, i32, i32, i32
  }
  func.func @transform_5(%arg0: i32) -> (i32, i32, i32) {
    %c0_i32 = arith.constant 0 : i32
    %c0_i32_0 = arith.constant 0 : i32
    %c0_i32_1 = arith.constant 0 : i32
    return %arg0, %c0_i32, %c0_i32_0 : i32, i32, i32
  }
  func.func @transform_6(%arg0: i32) -> (i32, i32, i32) {
    %c0_i32 = arith.constant 0 : i32
    %c0_i32_0 = arith.constant 0 : i32
    %c0_i32_1 = arith.constant 0 : i32
    return %arg0, %c0_i32, %c0_i32_0 : i32, i32, i32
  }
  func.func @transform_7(%arg0: i32) -> (i32, i32, i32) {
    %c0_i32 = arith.constant 0 : i32
    %c0_i32_0 = arith.constant 0 : i32
    %c0_i32_1 = arith.constant 0 : i32
    return %arg0, %c0_i32, %c0_i32_0 : i32, i32, i32
  }
  func.func @transform_8(%arg0: i32) -> (i32, i32, i32) {
    %c0_i32 = arith.constant 0 : i32
    %c0_i32_0 = arith.constant 0 : i32
    %c0_i32_1 = arith.constant 0 : i32
    return %arg0, %c0_i32, %c0_i32_0 : i32, i32, i32
  }
  func.func @transform_9(%arg0: i32) -> (i32, i32, i32) {
    %c0_i32 = arith.constant 0 : i32
    %c0_i32_0 = arith.constant 0 : i32
    %c0_i32_1 = arith.constant 0 : i32
    return %arg0, %c0_i32, %c0_i32_0 : i32, i32, i32
  }
  func.func @transform_10(%arg0: i32) -> (i32, i32) {
    %c0_i32 = arith.constant 0 : i32
    %c0_i32_0 = arith.constant 0 : i32
    %c0_i32_1 = arith.constant 0 : i32
    return %c0_i32, %c0_i32_0 : i32, i32
  }
}

</mosaic_0001>

<bundles_post_ra>
// kernel: tpu_custom_call.1
= control target key start
LH: loop header
LB: loop body
LE: loop exit
PB: predicated region body
PF: predicated region fallthrough
CT: control target
= control target key end

     0   :  { %s2288_s0 = inlined_call_operand.hbm [shape: f32[16,32], index: 0, kind: input, shape index: {}]   ;;  %s2289_s1 = inlined_call_operand.hbm [shape: f32[16,16], index: 1, kind: input, shape index: {}]   ;;  %s2290_s2 = inlined_call_operand.hbm [shape: f32[2,4,32], index: 2, kind: input, shape index: {}]   ;;  %s2291_s3 = inlined_call_operand.vmem [shape: f32[2,32,96], index: 3, kind: input, shape index: {}]   ;;  %s2292_s4 = inlined_call_operand.vmem [shape: f32[2,4,8,32], index: 4, kind: input, shape index: {}]   ;;  %s2293_s5 = inlined_call_operand.vmem [shape: f32[2,1,32], index: 5, kind: input, shape index: {}]   ;;  %s2294_s6 = inlined_call_operand.vmem [shape: f32[2,32,64], index: 6, kind: input, shape index: {}]   ;;  %s2295_s7 = inlined_call_operand.vmem [shape: f32[2,1,64], index: 7, kind: input, shape index: {}]   ;;  %s2296_s8 = inlined_call_operand.vmem [shape: f32[2,64,32], index: 8, kind: input, shape index: {}]   ;;  %s2297_s9 = inlined_call_operand.vmem [shape: f32[2,1,32], index: 9, kind: input, shape index: {}]   ;;  %s2298_s10 = inlined_call_operand.hbm [shape: f32[16,32], index: 10, kind: output, shape index: {}]  }
   0x1   :  { %2299 = sst [smem:[#allocation14_spill]] %s2288_s0 }
   0x2   :  { %2300 = sst [smem:[#allocation15_spill]] %s2289_s1 }
   0x3   :  { %2301 = sst [smem:[#allocation16_spill]] %s2290_s2 }
   0x4   :  { %2302 = sst [smem:[#allocation17_spill]] %s2291_s3 }
   0x5   :  { %15 = vsyncpa [#allocation4], 0 }
   0x6   :  { %16 = vsyncpa [#allocation7], 0 }
   0x7   :  { %17 = vsyncpa [#allocation5], 0  ;;  %s1923_s13 = smov 0   ;;  %s1925_s14 = smov 0  }
   0x8   :  { %s1927_s15 = smov 0   ;;  %s1929_s16 = smov 0  }
   0x9 LB: > { %s2303_s0 = sld [smem:[#allocation14_spill]]  ;;  %s1947_s20 = sadd.s32 4294967295, %s1853_s16   ;;  %s1853_s16 = sphi %s1929_s16, %s2315_s16   ;;  %s1849_s15 = sphi %s1927_s15, %s2314_s15   ;;  %s1845_s14 = sphi %s1925_s14, %s2313_s14   ;;  %s1841_s13 = sphi %s1923_s13, %s2312_s13  }
   0xa   : > { %p1474_p0 = scmp.ge.s32.totalorder %s1853_s16, 1  ;;  %p86_p1 = scmp.eq.s32.totalorder %s1947_s20, 0 }
   0xb   : > { %p299_p2 = scmp.lt.s32.totalorder %s1853_s16, 3  ;;  %p1475_p3 = scmp.ne.s32.totalorder %s1947_s20, 0 }
   0xc   : > { %s1855_s22 = smov [#allocation3]   ;;  %s2305_s1 = sld [smem:[#allocation15_spill]] }
   0xd   : > { %p1953_p4 = pnand %p1474_p0, %p299_p2  ;;  %s312_s23 = sshll.u32 %s1855_s22, 4  ;;  %s313_s23 = int_to_ptr.vmem [resolvable:$true] %s312_s23 }
   0xe   : > { %s1856_s27 = smov [#allocation6]   ;;  %s1857_s29 = smov 128  }
   0xf   : > { %s310_s19 = sshll.u32 %s2303_s0, 4  ;;  %p1557_p5 = pneg %p1953_p4  ;;  %s311_s19 = int_to_ptr.hbm [resolvable:$true] %s310_s19 }
  0x10   : > { %s326_s28 = sshll.u32 %s1856_s27, 4  ;;  %s1858_s30 = smov 8   ;;  %s327_s28 = int_to_ptr.vmem [resolvable:$true] %s326_s28 }
  0x11   : > { %p1558_p6 = pnand %p1557_p5, %p86_p1  ;;  %s1965_s11 = sadd.s32 1, %s1853_s16  }
  0x12   : > { %s324_s26 = sshll.u32 %s2305_s1, 4  ;;  %s72_s12 = sadd.s32 1, %s1849_s15  ;;  %s325_s26 = int_to_ptr.hbm [resolvable:$true] %s324_s26 }
  0x13   : > { %1560 = dma.hbm_to_vmem [thread:$0]  (!%p1558_p6), %s311_s19, 256, %s313_s23, [#allocation4], %s1857_s29, %s1857_s29, %s1858_s30  }
  0x14   : > { %1563 = dma.hbm_to_vmem [thread:$0]  (!%p1558_p6), %s325_s26, 256, %s327_s28, [#allocation7], %s1857_s29, %s1857_s29, %s1858_s30  }
  0x15   : > { %s69_s17 = ssub.s32 %s1853_s16, %s1965_s11  ;;  %p79_p7 = scmp.ne.s32.totalorder %s1849_s15, %s1845_s14 }
  0x16   : > { %p70_p8 = scmp.eq.s32.totalorder %s69_s17, 0  ;;  %p80_p9 = scmp.eq.s32.totalorder %s1853_s16, 0 }
  0x17   : > { %p85_p10 = scmp.ne.s32.totalorder %s1845_s14, %s1841_s13  ;;  %p1570_p11 = scmp.lt.s32.totalorder %s1853_s16, 2 }
  0x18   : > { %s1977_s18 = scalar_select %p70_p8, %s1849_s15, %s72_s12  }
  0x19   : > { %p81_p12 = por %p80_p9, %p79_p7  ;;  %p1981_p13 = por %p86_p1, %p85_p10 }
  0x1a   : > { %s340_s22 = sand.u32 1, %s1853_s16   ;;  %s342_s23 = sand.u32 1, %s1849_s15  }
  0x1b   : > { %s1478_s24 = sshll.u32 %s342_s23, 2  ;;  %s1479_s25 = sshll.u32 %s1853_s16, 2 }
  0x1c   : > { %s2307_s2 = sld [smem:[#allocation16_spill]]  ;;  %s344_s29 = scalar_lea.vmem [#allocation8], %s1478_s24 }
  0x1d   : > { %s352_s30 = sshll.u32 %s344_s29, 4  ;;  %p1993_p0 = pnand %p1570_p11, %p81_p12  ;;  %s353_s30 = int_to_ptr.vmem [resolvable:$true] %s352_s30 }
  0x1e   : > { %s341_s17 = scalar_lea.sflag [#allocation4], %s340_s22 }
  0x1f   : > { %p1753_p5 = pneg %p1993_p0 }
  0x22   : > { %s348_s28 = scalar_lea.hbm %s2307_s2, %s1479_s25  ;;  %s1756_s26 = scalar_lea.hbm %s2307_s2, 8 }
  0x23   : > { %s350_s13 = sshll.u32 %s348_s28, 4  ;;  %s351_s13 = int_to_ptr.hbm [resolvable:$true] %s350_s13 }
  0x24   : > { %s1749_s0 = sshra.s32 %s351_s13, 4  ;;  %s1750_s0 = int_to_ptr.hbm [resolvable:$true] %s1749_s0 }
  0x25   : > { %s1751_s23 = scalar_lea.hbm %s1750_s0, 4  ;;  %p1757_p8 = scmp.lt.s32.totalorder %s1750_s0, %s2307_s2 }
  0x26   : > { %p1752_p2 = scmp.ne.s32.totalorder %s1750_s0, %s1751_s23  ;;  %p1758_p9 = scmp.lt.s32.totalorder %s1756_s26, %s1751_s23 }
  0x28   : > { %p1754_p6 = pnand %p1753_p5, %p1752_p2  ;;  %p1759_p10 = por %p1758_p9, %p1757_p8 }
  0x2a   : > { %p1755_p7 = pneg %p1754_p6 }
  0x2c   : > { %p1760_p11 = pnand %p1759_p10, %p1755_p7 }
  0x2e   : > { %1763 = shalt.err (!%p1760_p11)
}
  0x2f   : > { %1567 = dma.hbm_to_vmem [thread:$0]  (!%p1993_p0), %s351_s13, 64, %s353_s30, %s341_s17  }
  0x30   : > { %411 = sbr.rel (%p1953_p4) target bundleno = 2083 (0x823), region = 60 }
  0x35   : > { %1824 = dma.done.wait (%p86_p1), [#allocation4], 256  }
  0x36   : > { %1826 = vsyncadd (%p86_p1), [#allocation4], 4294967040 }
  0x37   : > { %1828 = dma.done.wait (%p86_p1), [#allocation7], 256  }
  0x38   : > { %1830 = vsyncadd (%p86_p1), [#allocation7], 4294967040  ;;  %s423_s0 = sand.u32 1, %s1947_s20   ;;  %s425_s22 = sand.u32 1, %s1845_s14  }
  0x39   : > { %s2019_s28 = sshll.u32 %s425_s22, 2  ;;  %s424_s21 = scalar_lea.sflag [#allocation4], %s423_s0 }
  0x3a   : > { %1832 = dma.done.wait (%p1981_p13), %s424_s21, 64  }
  0x3b   : > { %1834 = vsyncadd (%p1981_p13), %s424_s21, 4294967232  ;;  %p489_p4 = scmp.lt.s32.totalorder %s1947_s20, 1  ;;  %s2309_s3 = sld [smem:[#allocation17_spill]] }
  0x3d   : > { %s2028_s30 = scalar_select %p489_p4, %s1947_s20, 1 }
  0x3e   : > { %521 = sbr.rel (%p1475_p3) target bundleno = 70 (0x46), region = 76 }
  0x3f   : > { %s1535_s13 = sshll.u32 %s2028_s30, 5  ;;  %s509_s12 = scalar_lea.vmem %s2295_s7, %s2028_s30 }
  0x40   : > { %s2043_s16 = scalar_lea.vmem %s2292_s4, %s1535_s13  ;;  %s2048_s21 = scalar_lea.vmem %s2294_s6, %s1535_s13 }
  0x41   : > { %s2038_s19 = scalar_lea.vmem %s2309_s3, %s1535_s13  ;;  %s1538_s17 = sshll.u32 %s2028_s30, 6 }
  0x42   : > { %s517_s24 = scalar_lea.vmem %s2297_s9, %s2028_s30  ;;  %s2062_s26 = scalar_lea.vmem %s2296_s8, %s1538_s17 }
  0x43   : > { %v522_v0 = vld [vmem:[#allocation3] sm:$0xff]  ;;  %vm524_vm0 = vcmask 261120   ;;  %v523_v1 = vld [vmem:[#allocation3 + $0x8] sm:$0xff] }
  0x44   : > { %525 = vst.msk [vmem:[#allocation2] sm:$0xff] %vm524_vm0, %v522_v0 }
  0x45   : > { %526 = vst.msk [vmem:[#allocation2 + $0x8] sm:$0xff] %vm524_vm0, %v523_v1 }
  0x46 PF: > { %vm530_vm1 = vcmask 261120   ;;  %v1859_v6 = vmov 32.0   ;;  %v591_v23 = vld [vmem:[%s2038_s19 + $0x18] sm:$0xff]  ;;  %v590_v24 = vld [vmem:[%s2038_s19 + $0x10] sm:$0xff]  ;;  %v589_v25 = vld [vmem:[%s2038_s19 + $0x8] sm:$0xff]  ;;  %s2310_s1 = scalar_lea.vmem [#allocation8], %s2019_s28  ;;  %s2311_s27 = scalar_lea.vmem %s2293_s5, %s2028_s30 }
  0x47   : > { %1643 = vrcp.f32 %v1859_v6  ;;  %1539 = vmatpush.msra.mxu3 %v591_v23  ;;  %610 = vmatpush.msra.mxu0 %v591_v23  ;;  %v588_v26 = vld [vmem:[%s2038_s19] sm:$0xff]  ;;  %v2090_v38 = vld [vmem:[%s2310_s1] sm:$0xf]  ;;  %s1860_s2 = smov 120   ;;  %s1861_s3 = smov 112   ;;  %vm657_vm9 = vcmask 64512  }
  0x48   : > { %v582_v42 = vperm.slane %v2090_v38, 0  ;;  %v585_v46 = vperm.slane %v2090_v38, 1  ;;  %s1862_s28 = smov 104   ;;  %s1863_s29 = smov 96   ;;  %vm794_vm10 = vcmask 130048  }
  0x49   : > { %1540 = vmatpush.msra.mxu3 %v590_v24  ;;  %611 = vmatpush.msra.mxu0 %v590_v24  ;;  %s1864_s13 = smov 64   ;;  %s1325_s1 = sshll.u32 %s2298_s10, 4  ;;  %s1326_s1 = int_to_ptr.hbm [resolvable:$true] %s1325_s1 }
  0x4a   : > { %p1573_p1 = scmp.eq.s32.totalorder %s1947_s20, 1  ;;  %s1866_s30 = smov 128  }
  0x4b   : > { %v2070_v4 = vld [vmem:[#allocation2] sm:$0xff]  ;;  %1541 = vmatpush.msra.mxu3 %v589_v25  ;;  %612 = vmatpush.msra.mxu0 %v589_v25 }
  0x4c   : > { %v2066_v2 = vld [vmem:[#allocation2 + $0x8] sm:$0xff]  ;;  %v531_v5 = vsel %vm530_vm1, %v2070_v4, 0.0 }
  0x4d   : > { %v534_v3 = vsel %vm530_vm1, %v2066_v2, 0.0  ;;  %v1644_v7 = vpop.eup %1643  ;;  %1542 = vmatpush.msra.mxu3 %v588_v26  ;;  %613 = vmatpush.msra.mxu0 %v588_v26 }
  0x4e   : > { %535 = vadd.xlane.f32.xlu0 %v534_v3  ;;  %v538_v8 = vmul.f32 32.0, %v1644_v7  ;;  %vm542_vm2 = vweird.f32 %v1644_v7 }
  0x50   : > { %v539_v9 = vsub.f32 1.0, %v538_v8 }
  0x52   : > { %v540_v10 = vmul.f32 %v1644_v7, %v539_v9 }
  0x54   : > { %v541_v11 = vadd.f32 %v1644_v7, %v540_v10 }
  0x56   : > { %532 = vadd.xlane.f32.xlu0 %v531_v5  ;;  %v2074_v12 = vsel %vm542_vm2, %v1644_v7, %v541_v11  ;;  %vm1282_vm2 = vcmask 523264  }
  0xc1   : > { %v536_v13 = vpop.xlane.xlu0 %535 }
  0xc2   : > { %v545_v14 = vmul.f32 %v2074_v12, %v536_v13 }
  0xc4   : > { %v547_v15 = vsub.f32 %v2066_v2, %v545_v14 }
  0xc6   : > { %v549_v16 = vmul.f32 %v547_v15, %v547_v15 }
  0xc8   : > { %v553_v17 = vsel %vm530_vm1, %v549_v16, 0.0 }
  0xc9   : > { %554 = vadd.xlane.f32.xlu1 %v553_v17  ;;  %v533_v18 = vpop.xlane.xlu0 %532 }
  0xca   : > { %v544_v19 = vmul.f32 %v2074_v12, %v533_v18 }
  0xcc   : > { %v546_v20 = vsub.f32 %v2070_v4, %v544_v19  ;;  %v651_v19 = vld [vmem:[#allocation6] sm:$0xff] }
  0xce   : > { %v548_v21 = vmul.f32 %v546_v20, %v546_v20 }
  0xd0   : > { %v550_v22 = vsel %vm530_vm1, %v548_v21, 0.0 }
  0xd1   : > { %551 = vadd.xlane.f32.xlu1 %v550_v22 }
 0x13c   : > { %v555_v27 = vpop.xlane.xlu1 %554 }
 0x13d   : > { %v557_v28 = vmul.f32 %v555_v27, %v2074_v12 }
 0x13f   : > { %v559_v29 = vadd.f32 1e-05, %v557_v28  ;;  %v652_v28 = vld [vmem:[#allocation6 + $0x8] sm:$0xff] }
 0x141   : > { %1645 = vrsqrt.f32 %v559_v29  ;;  %vm576_vm4 = vweird.f32 %v559_v29 }
 0x144   : > { %v552_v30 = vpop.xlane.xlu1 %551 }
 0x145   : > { %v556_v31 = vmul.f32 %v552_v30, %v2074_v12 }
 0x147   : > { %v1646_v32 = vpop.eup %1645  ;;  %v558_v33 = vadd.f32 1e-05, %v556_v31 }
 0x148   : > { %v571_v34 = vmul.f32 %v1646_v32, %v559_v29  ;;  %vm577_vm3 = vweird.f32 %v1646_v32 }
 0x149   : > { %1647 = vrsqrt.f32 %v558_v33  ;;  %vm578_vm5 = vmor %vm576_vm4, %vm577_vm3  ;;  %vm566_vm7 = vweird.f32 %v558_v33 }
 0x14a   : > { %v572_v35 = vmul.f32 %v1646_v32, %v571_v34 }
 0x14c   : > { %v573_v36 = vmul.f32 0.5, %v572_v35 }
 0x14e   : > { %v574_v37 = vsub.f32 1.5, %v573_v36 }
 0x14f   : > { %v1648_v39 = vpop.eup %1647 }
 0x150   : > { %v575_v40 = vmul.f32 %v1646_v32, %v574_v37  ;;  %v561_v41 = vmul.f32 %v1648_v39, %v558_v33  ;;  %vm567_vm6 = vweird.f32 %v1648_v39 }
 0x151   : > { %vm568_vm8 = vmor %vm566_vm7, %vm567_vm6 }
 0x152   : > { %v579_v43 = vsel %vm578_vm5, %v1646_v32, %v575_v40  ;;  %v562_v44 = vmul.f32 %v1648_v39, %v561_v41 }
 0x153   : > { %v581_v45 = vmul.f32 %v579_v43, %v547_v15 }
 0x154   : > { %v563_v47 = vmul.f32 0.5, %v562_v44 }
 0x155   : > { %v584_v48 = vmul.f32 %v582_v42, %v581_v45 }
 0x156   : > { %v564_v49 = vsub.f32 1.5, %v563_v47 }
 0x157   : > { %v587_v50 = vadd.f32 %v585_v46, %v584_v48 }
 0x158   : > { %v565_v51 = vmul.f32 %v1648_v39, %v564_v49 }
 0x159   : > { %1494 = vmatmul.msk.f32.vlgmr.msra.gmra.mxu3 %vm530_vm1, %v587_v50 }
 0x15a   : > { %v569_v52 = vsel %vm568_vm8, %v1648_v39, %v565_v51 }
 0x15b   : > { %v580_v53 = vmul.f32 %v569_v52, %v546_v20 }
 0x15d   : > { %v583_v54 = vmul.f32 %v582_v42, %v580_v53 }
 0x15f   : > { %v586_v55 = vadd.f32 %v585_v46, %v583_v54 }
 0x161   : > { %1493 = vmatmul.msk.f32.vlgmr.msra.gmra.mxu0 %vm530_vm1, %v586_v55 }
 0x1dc   : > { %v2096_v56 = vpop.f32.mrf.mxu3 }
 0x1dd   : > { %641 = vrot.lane.b32.xlu2 %v2096_v56, %s1860_s2  ;;  %v622_v61 = vmul.f32 0.35355338, %v2096_v56 }
 0x1de   : > { %v2099_v57 = vpop.f32.mrf.mxu0 }
 0x1df   : > { %643 = vrot.lane.b32.xlu1 %v2099_v57, %s1861_s3  ;;  %639 = vrot.lane.b32.xlu0 %v2099_v57, %s1860_s2  ;;  %v621_v60 = vmul.f32 0.35355338, %v2099_v57 }
 0x1e5   : > { %645 = vrot.lane.b32.xlu2 %v2096_v56, %s1861_s3 }
 0x1ed   : > { %649 = vrot.lane.b32.xlu2 %v2096_v56, %s1862_s28 }
 0x1f5   : > { %647 = vrot.lane.b32.xlu2 %v2099_v57, %s1862_s28 }
 0x237   : > { %v2106_v58 = vpop.permute.xlu2 %641 }
 0x238   : > { %691 = vrot.lane.b32.xlu2 %v2106_v58, %s1863_s29 }
 0x23f   : > { %v2109_v59 = vpop.permute.xlu2 %645 }
 0x240   : > { %726 = vrot.lane.b32.xlu0 %v2109_v59, %s1863_s29 }
 0x247   : > { %v2120_v0 = vpop.permute.xlu2 %649 }
 0x248   : > { %625 = vrot.lane.b32.xlu0 %v621_v60, %s1860_s2 }
 0x24f   : > { %v2125_v1 = vpop.permute.xlu2 %647 }
 0x250   : > { %631 = vrot.lane.b32.xlu0 %v622_v61, %s1861_s3 }
 0x251   : > { %v2114_v62 = vpop.permute.xlu1 %643  ;;  %v2116_v63 = vpop.permute.xlu0 %639 }
 0x252   : > { %724 = vrot.lane.b32.xlu1 %v2114_v62, %s1863_s29  ;;  %689 = vrot.lane.b32.xlu2 %v2116_v63, %s1863_s29  ;;  %v1620_v46 = vpack.i.bf16 %v2116_v63, %v2106_v58 }
 0x258   : > { %761 = vrot.lane.b32.xlu0 %v2120_v0, %s1863_s29 }
 0x25a   : > { %627 = vrot.lane.b32.xlu1 %v622_v61, %s1860_s2  ;;  %629 = vrot.lane.b32.xlu2 %v621_v60, %s1861_s3 }
 0x260   : > { %635 = vrot.lane.b32.xlu0 %v622_v61, %s1862_s28 }
 0x262   : > { %653 = vrot.lane.b32.xlu1 %v2099_v57, %s1863_s29  ;;  %655 = vrot.lane.b32.xlu2 %v2096_v56, %s1863_s29 }
 0x26a   : > { %633 = vrot.lane.b32.xlu1 %v621_v60, %s1862_s28  ;;  %759 = vrot.lane.b32.xlu2 %v2125_v1, %s1863_s29 }
 0x292   : > { %v692_v3 = vpop.permute.xlu2 %691 }
 0x293   : > { %1499 = vmatpush.xpose.msk.msra.mxu2 %vm657_vm9, %v692_v3 }
 0x2ac   : > { %v690_v5 = vpop.permute.xlu2 %689 }
 0x2ad   : > { %1500 = vmatpush.xpose.msk.msra.mxu2 %vm657_vm9, %v690_v5 }
 0x2b2   : > { %v727_v6 = vpop.permute.xlu0 %726 }
 0x2b3   : > { %1503 = vmatpush.xpose.msk.msrb.mxu3 %vm657_vm9, %v727_v6 }
 0x2b4   : > { %v630_v7 = vpop.permute.xlu2 %629 }
 0x2ba   : > { %v626_v8 = vpop.permute.xlu0 %625 }
 0x2bb   : > { %1501 = vmatmul.msk.f32.vlgmr.msra.gmra.mxu2 %vm657_vm9, %v626_v8 }
 0x2bc   : > { %v656_v9 = vpop.permute.xlu2 %655 }
 0x2bd   : > { %1495 = vmatpush.xpose.msk.msra.mxu1 %vm657_vm9, %v656_v9 }
 0x2c2   : > { %v632_v10 = vpop.permute.xlu0 %631 }
 0x2c4   : > { %v725_v11 = vpop.permute.xlu1 %724  ;;  %v760_v15 = vpop.permute.xlu2 %759 }
 0x2c5   : > { %1504 = vmatpush.xpose.msk.msrb.mxu3 %vm657_vm9, %v725_v11 }
 0x2c8   : > { %1505 = vmatmul.msk.f32.vlgmr.msrb.gmra.mxu3 %vm657_vm9, %v630_v7 }
 0x2ca   : > { %v762_v13 = vpop.permute.xlu0 %761 }
 0x2cb   : > { %1507 = vmatpush.xpose.msk.msrb.mxu0 %vm657_vm9, %v762_v13 }
 0x2cc   : > { %v628_v14 = vpop.permute.xlu1 %627 }
 0x2cd   : > { %1502 = vmatmul.msk.f32.gmra.mxu2 %vm657_vm9, %v628_v14 }
 0x2cf   : > { %1508 = vmatpush.xpose.msk.msrb.mxu0 %vm657_vm9, %v760_v15 }
 0x2d0   : > { %1506 = vmatmul.msk.f32.gmra.mxu3 %vm657_vm9, %v632_v10 }
 0x2d2   : > { %v636_v18 = vpop.permute.xlu0 %635 }
 0x2d4   : > { %v654_v16 = vpop.permute.xlu1 %653 }
 0x2d5   : > { %1496 = vmatpush.xpose.msk.msra.mxu1 %vm657_vm9, %v654_v16  ;;  %v1625_v16 = vpack.i.bf16 %v2114_v62, %v2109_v59 }
 0x2d8   : > { %1497 = vmatmul.msk.f32.vlgmr.msra.gmra.mxu1 %vm657_vm9, %v621_v60 }
 0x2dc   : > { %v634_v17 = vpop.permute.xlu1 %633 }
 0x2dd   : > { %1509 = vmatmul.msk.f32.vlgmr.msrb.gmra.mxu0 %vm657_vm9, %v634_v17 }
 0x2e0   : > { %1498 = vmatmul.msk.f32.gmra.mxu1 %vm657_vm9, %v622_v61 }
 0x2e5   : > { %1510 = vmatmul.msk.f32.gmra.mxu0 %vm657_vm9, %v636_v18  ;;  %v1630_v18 = vpack.i.bf16 %v2099_v57, %v2096_v56 }
 0x33e   : > { %v718_v21 = vpop.f32.mrf.mxu2 }
 0x33f   : > { %v719_v37 = vadd.f32 %v718_v21, %v651_v19 }
 0x341   : > { %v801_v41 = vsel %vm794_vm10, %v719_v37, -inf }
 0x34b   : > { %v753_v24 = vpop.f32.mrf.mxu3 }
 0x34c   : > { %v754_v27 = vadd.f32 %v753_v24, %v651_v19 }
 0x34e   : > { %v807_v34 = vsel %vm794_vm10, %v754_v27, -inf }
 0x350   : > { %v721_v31 = vpop.f32.mrf.mxu2 }
 0x351   : > { %v2151_v35 = vadd.f32 %v721_v31, %v652_v28 }
 0x353   : > { %v804_v40 = vsel %vm794_vm10, %v2151_v35, -inf  ;;  %v756_v43 = vpop.f32.mrf.mxu3 }
 0x354   : > { %v757_v44 = vadd.f32 %v756_v43, %v652_v28 }
 0x355   : > { %v683_v20 = vpop.f32.mrf.mxu1 }
 0x356   : > { %v684_v22 = vadd.f32 %v683_v20, %v651_v19  ;;  %v810_v45 = vsel %vm794_vm10, %v757_v44, -inf }
 0x358   : > { %v795_v23 = vsel %vm794_vm10, %v684_v22, -inf }
 0x359   : > { %796 = vmax.xlane.f32.xlu1 %v795_v23 }
 0x35a   : > { %v788_v25 = vpop.f32.mrf.mxu0 }
 0x35b   : > { %v789_v26 = vadd.f32 %v788_v25, %v651_v19 }
 0x35d   : > { %v686_v29 = vpop.f32.mrf.mxu1  ;;  %v813_v30 = vsel %vm794_vm10, %v789_v26, -inf }
 0x35e   : > { %v2146_v32 = vadd.f32 %v686_v29, %v652_v28  ;;  %814 = vmax.xlane.f32.xlu0 %v813_v30  ;;  %v1635_v29 = vpack.i.bf16 %v2125_v1, %v2120_v0 }
 0x360   : > { %v798_v33 = vsel %vm794_vm10, %v2146_v32, -inf }
 0x361   : > { %799 = vmax.xlane.f32.xlu2 %v798_v33  ;;  %808 = vmax.xlane.f32.xlu1 %v807_v34 }
 0x362   : > { %v791_v36 = vpop.f32.mrf.mxu0 }
 0x363   : > { %v2153_v39 = vadd.f32 %v791_v36, %v652_v28 }
 0x365   : > { %v816_v42 = vsel %vm794_vm10, %v2153_v39, -inf }
 0x366   : > { %805 = vmax.xlane.f32.xlu0 %v804_v40 }
 0x369   : > { %802 = vmax.xlane.f32.xlu2 %v801_v41  ;;  %817 = vmax.xlane.f32.xlu1 %v816_v42 }
 0x371   : > { %811 = vmax.xlane.f32.xlu2 %v810_v45 }
 0x382   : > { %1621 = vrot.lane.b32.xlu1 %v1620_v46, %s1864_s13 }
 0x3cc   : > { %v797_v47 = vpop.xlane.xlu1 %796 }
 0x3cd   : > { %v819_v3 = vsub.f32 %v684_v22, %v797_v47 }
 0x3cf   : > { %v827_v7 = vmul.f32 1.442695, %v819_v3 }
 0x3d1   : > { %v815_v48 = vpop.xlane.xlu0 %814 }
 0x3d2   : > { %v825_v49 = vsub.f32 %v789_v26, %v815_v48 }
 0x3d4   : > { %v839_v50 = vmul.f32 1.442695, %v825_v49  ;;  %v809_v51 = vpop.xlane.xlu1 %808  ;;  %v800_v52 = vpop.xlane.xlu2 %799 }
 0x3d5   : > { %v823_v53 = vsub.f32 %v754_v27, %v809_v51  ;;  %v820_v19 = vsub.f32 %v2146_v32, %v800_v52 }
 0x3d6   : > { %1649 = vpow2.f32 %v839_v50 }
 0x3d7   : > { %v835_v54 = vmul.f32 1.442695, %v823_v53  ;;  %v829_v20 = vmul.f32 1.442695, %v820_v19 }
 0x3d9   : > { %1651 = vpow2.f32 %v835_v54  ;;  %v806_v21 = vpop.xlane.xlu0 %805 }
 0x3da   : > { %v822_v22 = vsub.f32 %v2151_v35, %v806_v21 }
 0x3dc   : > { %v2164_v55 = vpop.eup %1649  ;;  %v803_v60 = vpop.xlane.xlu2 %802  ;;  %v833_v24 = vmul.f32 1.442695, %v822_v22 }
 0x3dd   : > { %v821_v61 = vsub.f32 %v719_v37, %v803_v60  ;;  %v861_v58 = vsel %vm794_vm10, %v2164_v55, 0.0  ;;  %v818_v10 = vpop.xlane.xlu1 %817 }
 0x3de   : > { %862 = vadd.xlane.f32.xlu1 %v861_v58  ;;  %v826_v40 = vsub.f32 %v2153_v39, %v818_v10  ;;  %v1023_v10 = vld [vmem:[%s2043_s16] sm:$0xff] }
 0x3df   : > { %v1652_v63 = vpop.eup %1651  ;;  %v831_v5 = vmul.f32 1.442695, %v821_v61 }
 0x3e0   : > { %v855_v6 = vsel %vm794_vm10, %v1652_v63, 0.0  ;;  %v841_v0 = vmul.f32 1.442695, %v826_v40 }
 0x3e1   : > { %1653 = vpow2.f32 %v831_v5  ;;  %856 = vadd.xlane.f32.xlu2 %v855_v6 }
 0x3e2   : > { %1655 = vpow2.f32 %v827_v7 }
 0x3e3   : > { %1657 = vpow2.f32 %v829_v20 }
 0x3e4   : > { %v812_v62 = vpop.xlane.xlu2 %811  ;;  %1659 = vpow2.f32 %v833_v24 }
 0x3e5   : > { %v824_v25 = vsub.f32 %v757_v44, %v812_v62 }
 0x3e7   : > { %v1654_v8 = vpop.eup %1653  ;;  %v837_v26 = vmul.f32 1.442695, %v824_v25 }
 0x3e8   : > { %v849_v9 = vsel %vm794_vm10, %v1654_v8, 0.0  ;;  %v1656_v11 = vpop.eup %1655 }
 0x3e9   : > { %850 = vadd.xlane.f32.xlu0 %v849_v9  ;;  %v843_v13 = vsel %vm794_vm10, %v1656_v11, 0.0  ;;  %v1658_v23 = vpop.eup %1657  ;;  %1661 = vpow2.f32 %v837_v26  ;;  %v1024_v9 = vld [vmem:[%s2043_s16 + $0x8] sm:$0xff] }
 0x3ea   : > { %v846_v59 = vsel %vm794_vm10, %v1658_v23, 0.0  ;;  %v1660_v27 = vpop.eup %1659 }
 0x3eb   : > { %v852_v56 = vsel %vm794_vm10, %v1660_v27, 0.0 }
 0x3ef   : > { %v1662_v57 = vpop.eup %1661 }
 0x3f0   : > { %v858_v28 = vsel %vm794_vm10, %v1662_v57, 0.0 }
 0x3f1   : > { %844 = vadd.xlane.f32.xlu0 %v843_v13 }
 0x3f4   : > { %v1622_v14 = vpop.permute.xlu1 %1621 }
 0x3f5   : > { %v1623_v15 = vunpack.i.l.bf16 %v1622_v14  ;;  %v1624_v17 = vunpack.i.h.bf16 %v1622_v14 }
 0x3f7   : > { %944 = vmatpush.msrb.mxu2 %v1623_v15 }
 0x3f9   : > { %1626 = vrot.lane.b32.xlu2 %v1625_v16, %s1864_s13  ;;  %945 = vmatpush.msrb.mxu2 %v1624_v17 }
 0x3fb   : > { %1077 = vmatpush.msra.mxu2 %v1024_v9 }
 0x405   : > { %1631 = vrot.lane.b32.xlu0 %v1630_v18, %s1864_s13  ;;  %v1026_v18 = vld [vmem:[%s2043_s16 + $0x18] sm:$0xff] }
 0x422   : > { %847 = vadd.xlane.f32.xlu2 %v846_v59 }
 0x42f   : > { %853 = vadd.xlane.f32.xlu0 %v852_v56 }
 0x437   : > { %859 = vadd.xlane.f32.xlu0 %v858_v28  ;;  %v1640_v28 = vld [vmem:[%s2311_s27] ss:$0 sm:$0xff] }
 0x44b   : > { %1636 = vrot.lane.b32.xlu0 %v1635_v29, %s1864_s13 }
 0x451   : > { %v863_v58 = vpop.xlane.xlu1 %862 }
 0x454   : > { %v857_v30 = vpop.xlane.xlu2 %856 }
 0x455   : > { %1663 = vrcp.f32 %v857_v30 }
 0x45b   : > { %v1664_v33 = vpop.eup %1663 }
 0x45c   : > { %v1627_v31 = vpop.permute.xlu2 %1626  ;;  %v851_v32 = vpop.xlane.xlu0 %850  ;;  %v879_v36 = vmul.f32 %v1664_v33, %v1652_v63 }
 0x45d   : > { %v1628_v34 = vunpack.i.l.bf16 %v1627_v31  ;;  %1665 = vrcp.f32 %v851_v32  ;;  %v1629_v35 = vunpack.i.h.bf16 %v1627_v31 }
 0x45e   : > { %1667 = vpow2.f32 %v841_v0 }
 0x45f   : > { %979 = vmatpush.msra.mxu3 %v1628_v34 }
 0x461   : > { %980 = vmatpush.msra.mxu3 %v1629_v35 }
 0x462   : > { %1515 = vmatmul.msk.f32.vlgmr.msra.gmra.mxu3 %vm794_vm10, %v879_v36 }
 0x463   : > { %v1666_v37 = vpop.eup %1665 }
 0x464   : > { %v877_v41 = vmul.f32 %v1666_v37, %v1654_v8  ;;  %v845_v1 = vpop.xlane.xlu0 %844  ;;  %v1668_v42 = vpop.eup %1667  ;;  %v1025_v8 = vld [vmem:[%s2043_s16 + $0x10] sm:$0xff] }
 0x465   : > { %1669 = vrcp.f32 %v845_v1  ;;  %v864_v43 = vsel %vm794_vm10, %v1668_v42, 0.0  ;;  %1106 = vmatpush.msrb.mxu3 %v1025_v8 }
 0x466   : > { %1513 = vmatmul.msk.f32.vlgmr.msrb.gmra.mxu2 %vm794_vm10, %v877_v41 }
 0x46b   : > { %v1670_v45 = vpop.eup %1669 }
 0x46c   : > { %v875_v48 = vmul.f32 %v1670_v45, %v1656_v11 }
 0x475   : > { %865 = vadd.xlane.f32.xlu0 %v864_v43 }
 0x477   : > { %v1632_v44 = vpop.permute.xlu0 %1631 }
 0x478   : > { %v1633_v46 = vunpack.i.l.bf16 %v1632_v44  ;;  %v1634_v47 = vunpack.i.h.bf16 %v1632_v44 }
 0x47a   : > { %909 = vmatpush.msrb.mxu1 %v1633_v46 }
 0x47c   : > { %910 = vmatpush.msrb.mxu1 %v1634_v47 }
 0x47d   : > { %1511 = vmatmul.msk.f32.vlgmr.msrb.gmra.mxu1 %vm794_vm10, %v875_v48 }
 0x47e   : > { %1048 = vmatpush.msra.mxu1 %v1023_v10 }
 0x495   : > { %v848_v39 = vpop.xlane.xlu2 %847 }
 0x496   : > { %1671 = vrcp.f32 %v848_v39 }
 0x49c   : > { %v1672_v49 = vpop.eup %1671 }
 0x49d   : > { %v876_v50 = vmul.f32 %v1672_v49, %v1658_v23 }
 0x49f   : > { %1512 = vmatmul.msk.f32.gmra.mxu1 %vm794_vm10, %v876_v50 }
 0x4a2   : > { %v854_v51 = vpop.xlane.xlu0 %853 }
 0x4a3   : > { %1673 = vrcp.f32 %v854_v51 }
 0x4a9   : > { %v1674_v52 = vpop.eup %1673 }
 0x4aa   : > { %v860_v53 = vpop.xlane.xlu0 %859  ;;  %v878_v54 = vmul.f32 %v1674_v52, %v1660_v27 }
 0x4ab   : > { %1675 = vrcp.f32 %v860_v53 }
 0x4ac   : > { %1514 = vmatmul.msk.f32.gmra.mxu2 %vm794_vm10, %v878_v54  ;;  %1677 = vrcp.f32 %v863_v58  ;;  %v1216_v58 = vld [vmem:[%s2048_s21 + $0x8] sm:$0xff] }
 0x4b1   : > { %v1676_v60 = vpop.eup %1675 }
 0x4b2   : > { %v880_v61 = vmul.f32 %v1676_v60, %v1662_v57  ;;  %v1678_v3 = vpop.eup %1677  ;;  %v1218_v60 = vld [vmem:[%s2048_s21 + $0x18] sm:$0xff] }
 0x4b3   : > { %v881_v7 = vmul.f32 %v1678_v3, %v2164_v55  ;;  %1241 = vmatpush.msrb.mxu1 %v1218_v60 }
 0x4b4   : > { %1516 = vmatmul.msk.f32.gmra.mxu3 %vm794_vm10, %v880_v61  ;;  %v1217_v61 = vld [vmem:[%s2048_s21 + $0x10] sm:$0xff] }
 0x4b5   : > { %1242 = vmatpush.msrb.mxu1 %v1217_v61  ;;  %v1642_v61 = vld [vmem:[%s517_s24] ss:$0 sm:$0xff]  ;;  %s1867_s24 = smov 8  }
 0x4b7   : > { %1243 = vmatpush.msrb.mxu1 %v1216_v58 }
 0x4bd   : > { %v1637_v63 = vpop.permute.xlu0 %1636 }
 0x4be   : > { %v1638_v5 = vunpack.i.l.bf16 %v1637_v63  ;;  %v1639_v6 = vunpack.i.h.bf16 %v1637_v63  ;;  %v1215_v63 = vld [vmem:[%s2048_s21] sm:$0xff] }
 0x4bf   : > { %1244 = vmatpush.msrb.mxu1 %v1215_v63 }
 0x4c0   : > { %1014 = vmatpush.msra.mxu0 %v1638_v5 }
 0x4c2   : > { %1015 = vmatpush.msra.mxu0 %v1639_v6 }
 0x4c3   : > { %1517 = vmatmul.msk.f32.vlgmr.msra.gmra.mxu0 %vm794_vm10, %v881_v7 }
 0x4c4   : > { %1135 = vmatpush.msrb.mxu0 %v1026_v18 }
 0x4e5   : > { %v982_v11 = vpop.f32.mrf.mxu3 }
 0x4e6   : > { %1523 = vmatmul.msk.f32.vlgmr.msrb.gmra.mxu3 %vm657_vm9, %v982_v11 }
 0x4e8   : > { %v866_v13 = vpop.xlane.xlu0 %865 }
 0x4e9   : > { %1679 = vrcp.f32 %v866_v13  ;;  %v947_v14 = vpop.f32.mrf.mxu2 }
 0x4ea   : > { %1521 = vmatmul.msk.f32.vlgmr.msra.gmra.mxu2 %vm657_vm9, %v947_v14  ;;  %v1209_v14 = vperm.slane %v2090_v38, 2 }
 0x4ef   : > { %v1680_v15 = vpop.eup %1679 }
 0x4f0   : > { %v882_v55 = vmul.f32 %v1680_v15, %v1668_v42 }
 0x4f2   : > { %1518 = vmatmul.msk.f32.gmra.mxu0 %vm794_vm10, %v882_v55 }
 0x4fa   : > { %v912_v16 = vpop.f32.mrf.mxu1 }
 0x4fb   : > { %1519 = vmatmul.msk.f32.vlgmr.msra.gmra.mxu1 %vm657_vm9, %v912_v16  ;;  %v1212_v16 = vperm.slane %v2090_v38, 3 }
 0x51c   : > { %v915_v17 = vpop.f32.mrf.mxu1 }
 0x51d   : > { %1520 = vmatmul.msk.f32.gmra.mxu1 %vm657_vm9, %v915_v17 }
 0x52f   : > { %v950_v19 = vpop.f32.mrf.mxu2 }
 0x530   : > { %1522 = vmatmul.msk.f32.gmra.mxu2 %vm657_vm9, %v950_v19 }
 0x537   : > { %v985_v20 = vpop.f32.mrf.mxu3 }
 0x538   : > { %1524 = vmatmul.msk.f32.gmra.mxu3 %vm657_vm9, %v985_v20 }
 0x540   : > { %v1017_v21 = vpop.f32.mrf.mxu0 }
 0x541   : > { %1525 = vmatmul.msk.f32.vlgmr.msrb.gmra.mxu0 %vm657_vm9, %v1017_v21 }
 0x569   : > { %v1108_v25 = vpop.f32.mrf.mxu3 }
 0x56a   : > { %v1146_v27 = vsel %vm530_vm1, %v1108_v25, 0.0 }
 0x56d   : > { %v1079_v24 = vpop.f32.mrf.mxu2 }
 0x56e   : > { %v1144_v62 = vsel %vm530_vm1, %v1079_v24, 0.0 }
 0x56f   : > { %v1020_v22 = vpop.f32.mrf.mxu0 }
 0x570   : > { %1526 = vmatmul.msk.f32.gmra.mxu0 %vm657_vm9, %v1020_v22 }
 0x578   : > { %v1050_v23 = vpop.f32.mrf.mxu1 }
 0x579   : > { %v1143_v59 = vsel %vm530_vm1, %v1050_v23, 0.0 }
 0x57a   : > { %v1145_v26 = vadd.f32 %v1144_v62, %v1143_v59 }
 0x57c   : > { %v1147_v57 = vadd.f32 %v1146_v27, %v1145_v26 }
 0x59a   : > { %v1053_v35 = vpop.f32.mrf.mxu1 }
 0x59b   : > { %v1150_v40 = vsel %vm530_vm1, %v1053_v35, 0.0  ;;  %v1641_v35 = vld [vmem:[%s509_s12] ss:$0 sm:$0xff]  ;;  %s1865_s12 = smov [#allocation9]  }
 0x59c   : > { %s1323_s17 = sshll.u32 %s1865_s12, 4  ;;  %s1324_s17 = int_to_ptr.vmem [resolvable:$true] %s1323_s17 }
 0x5b3   : > { %v1082_v34 = vpop.f32.mrf.mxu2 }
 0x5b4   : > { %v1151_v37 = vsel %vm530_vm1, %v1082_v34, 0.0  ;;  %v1270_v34 = vld [vmem:[%s2062_s26] sm:$0xff] }
 0x5b5   : > { %v1152_v0 = vadd.f32 %v1151_v37, %v1150_v40 }
 0x5bb   : > { %v1111_v36 = vpop.f32.mrf.mxu3 }
 0x5bc   : > { %v1153_v41 = vsel %vm530_vm1, %v1111_v36, 0.0 }
 0x5bd   : > { %v1154_v1 = vadd.f32 %v1153_v41, %v1152_v0 }
 0x5be   : > { %v1137_v56 = vpop.f32.mrf.mxu0 }
 0x5bf   : > { %v1148_v29 = vsel %vm530_vm1, %v1137_v56, 0.0  ;;  %v1277_v56 = vld [vmem:[%s2062_s26 + $0x38] sm:$0xff] }
 0x5c0   : > { %v1149_v30 = vadd.f32 %v1148_v29, %v1147_v57  ;;  %1297 = vmatpush.msrb.mxu2 %v1277_v56  ;;  %v1276_v57 = vld [vmem:[%s2062_s26 + $0x30] sm:$0xff]  ;;  %v1274_v29 = vld [vmem:[%s2062_s26 + $0x20] sm:$0xff] }
 0x5c2   : > { %v1161_v31 = vadd.f32 %v1640_v28, %v1149_v30  ;;  %1298 = vmatpush.msrb.mxu2 %v1276_v57  ;;  %v1273_v30 = vld [vmem:[%s2062_s26 + $0x18] sm:$0xff] }
 0x5c4   : > { %v2218_v32 = vadd.f32 %v1161_v31, %v2070_v4  ;;  %v1272_v31 = vld [vmem:[%s2062_s26 + $0x10] sm:$0xff] }
 0x5c6   : > { %v1165_v33 = vsel %vm530_vm1, %v2218_v32, 0.0 }
 0x5c7   : > { %1166 = vadd.xlane.f32.xlu1 %v1165_v33  ;;  %v1271_v33 = vld [vmem:[%s2062_s26 + $0x8] sm:$0xff] }
 0x5ed   : > { %v1140_v42 = vpop.f32.mrf.mxu0 }
 0x5ee   : > { %v1155_v43 = vsel %vm530_vm1, %v1140_v42, 0.0 }
 0x5ef   : > { %v1156_v4 = vadd.f32 %v1155_v43, %v1154_v1 }
 0x5f1   : > { %v1162_v44 = vadd.f32 %v1640_v28, %v1156_v4  ;;  %v1275_v28 = vld [vmem:[%s2062_s26 + $0x28] sm:$0xff] }
 0x5f2   : > { %1299 = vmatpush.msrb.mxu2 %v1275_v28 }
 0x5f3   : > { %v2227_v45 = vadd.f32 %v1162_v44, %v2066_v2 }
 0x5f4   : > { %1300 = vmatpush.msrb.mxu2 %v1274_v29 }
 0x5f5   : > { %v1168_v46 = vsel %vm530_vm1, %v2227_v45, 0.0 }
 0x5f6   : > { %1169 = vadd.xlane.f32.xlu2 %v1168_v46  ;;  %1301 = vmatpush.msrb.mxu2 %v1273_v30 }
 0x5f8   : > { %1302 = vmatpush.msrb.mxu2 %v1272_v31 }
 0x5fa   : > { %1303 = vmatpush.msrb.mxu2 %v1271_v33 }
 0x5fc   : > { %1304 = vmatpush.msrb.mxu2 %v1270_v34 }
 0x63a   : > { %v1167_v47 = vpop.xlane.xlu1 %1166 }
 0x63b   : > { %v1171_v48 = vmul.f32 %v1167_v47, %v2074_v12 }
 0x63d   : > { %v1173_v39 = vsub.f32 %v2218_v32, %v1171_v48 }
 0x63f   : > { %v1175_v49 = vmul.f32 %v1173_v39, %v1173_v39 }
 0x641   : > { %v1177_v50 = vsel %vm530_vm1, %v1175_v49, 0.0 }
 0x642   : > { %1178 = vadd.xlane.f32.xlu1 %v1177_v50 }
 0x669   : > { %v1170_v51 = vpop.xlane.xlu2 %1169 }
 0x66a   : > { %v1172_v2 = vmul.f32 %v1170_v51, %v2074_v12 }
 0x66c   : > { %v1174_v52 = vsub.f32 %v2227_v45, %v1172_v2 }
 0x66e   : > { %v1176_v53 = vmul.f32 %v1174_v52, %v1174_v52 }
 0x670   : > { %v1180_v54 = vsel %vm530_vm1, %v1176_v53, 0.0 }
 0x671   : > { %1181 = vadd.xlane.f32.xlu2 %v1180_v54 }
 0x6b5   : > { %v1179_v3 = vpop.xlane.xlu1 %1178 }
 0x6b6   : > { %v1183_v5 = vmul.f32 %v1179_v3, %v2074_v12 }
 0x6b8   : > { %v1185_v6 = vadd.f32 1e-05, %v1183_v5 }
 0x6ba   : > { %1681 = vrsqrt.f32 %v1185_v6  ;;  %vm1193_vm12 = vweird.f32 %v1185_v6 }
 0x6c0   : > { %v1682_v7 = vpop.eup %1681 }
 0x6c1   : > { %v1188_v8 = vmul.f32 %v1682_v7, %v1185_v6  ;;  %vm1194_vm11 = vweird.f32 %v1682_v7 }
 0x6c2   : > { %vm1195_vm13 = vmor %vm1193_vm12, %vm1194_vm11 }
 0x6c3   : > { %v1189_v9 = vmul.f32 %v1682_v7, %v1188_v8 }
 0x6c5   : > { %v1190_v10 = vmul.f32 0.5, %v1189_v9 }
 0x6c7   : > { %v1191_v11 = vsub.f32 1.5, %v1190_v10 }
 0x6c9   : > { %v1192_v13 = vmul.f32 %v1682_v7, %v1191_v11 }
 0x6cb   : > { %v1196_v15 = vsel %vm1195_vm13, %v1682_v7, %v1192_v13 }
 0x6cc   : > { %v1207_v55 = vmul.f32 %v1196_v15, %v1173_v39 }
 0x6ce   : > { %v1210_v17 = vmul.f32 %v1209_v14, %v1207_v55 }
 0x6d0   : > { %v1213_v18 = vadd.f32 %v1212_v16, %v1210_v17 }
 0x6d2   : > { %1527 = vmatmul.msk.f32.vlgmr.msrb.gmra.mxu1 %vm530_vm1, %v1213_v18 }
 0x6e4   : > { %v1182_v19 = vpop.xlane.xlu2 %1181 }
 0x6e5   : > { %v1184_v20 = vmul.f32 %v1182_v19, %v2074_v12 }
 0x6e7   : > { %v1186_v21 = vadd.f32 1e-05, %v1184_v20 }
 0x6e9   : > { %1683 = vrsqrt.f32 %v1186_v21  ;;  %vm1203_vm15 = vweird.f32 %v1186_v21 }
 0x6ef   : > { %v1684_v22 = vpop.eup %1683 }
 0x6f0   : > { %v1198_v23 = vmul.f32 %v1684_v22, %v1186_v21  ;;  %vm1204_vm14 = vweird.f32 %v1684_v22 }
 0x6f1   : > { %vm1205_vm0 = vmor %vm1203_vm15, %vm1204_vm14 }
 0x6f2   : > { %v1199_v24 = vmul.f32 %v1684_v22, %v1198_v23 }
 0x6f4   : > { %v1200_v59 = vmul.f32 0.5, %v1199_v24 }
 0x6f6   : > { %v1201_v62 = vsub.f32 1.5, %v1200_v59 }
 0x6f8   : > { %v1202_v38 = vmul.f32 %v1684_v22, %v1201_v62 }
 0x6fa   : > { %v1206_v25 = vsel %vm1205_vm0, %v1684_v22, %v1202_v38 }
 0x6fb   : > { %v1208_v12 = vmul.f32 %v1206_v25, %v1174_v52 }
 0x6fd   : > { %v1211_v26 = vmul.f32 %v1209_v14, %v1208_v12 }
 0x6ff   : > { %v1214_v27 = vadd.f32 %v1212_v16, %v1211_v26 }
 0x701   : > { %1528 = vmatmul.msk.f32.gmra.mxu1 %vm530_vm1, %v1214_v27 }
 0x74f   : > { %v1246_v36 = vpop.f32.mrf.mxu1 }
 0x750   : > { %v1247_v37 = vadd.f32 %v1641_v35, %v1246_v36 }
 0x752   : > { %v1254_v40 = vmul.f32 0.044715, %v1247_v37  ;;  %v1252_v4 = vmul.f32 0.5, %v1247_v37 }
 0x754   : > { %v1256_v41 = vmul.f32 %v1254_v40, %v1247_v37 }
 0x756   : > { %v1258_v0 = vmul.f32 %v1256_v41, %v1247_v37 }
 0x758   : > { %v1260_v1 = vadd.f32 %v1258_v0, %v1247_v37 }
 0x75a   : > { %v1262_v42 = vmul.f32 0.7978846, %v1260_v1 }
 0x75c   : > { %1685 = vtanh.f32 %v1262_v42 }
 0x762   : > { %v1686_v43 = vpop.eup %1685 }
 0x763   : > { %v1266_v44 = vadd.f32 1.0, %v1686_v43 }
 0x765   : > { %v1268_v46 = vmul.f32 %v1266_v44, %v1252_v4 }
 0x767   : > { %1529 = vmatmul.msk.f32.vlgmr.msrb.gmra.mxu2 %vm1282_vm2, %v1268_v46 }
 0x77e   : > { %v1249_v47 = vpop.f32.mrf.mxu1 }
 0x77f   : > { %v1250_v48 = vadd.f32 %v1641_v35, %v1249_v47 }
 0x781   : > { %v1255_v39 = vmul.f32 0.044715, %v1250_v48  ;;  %v1253_v53 = vmul.f32 0.5, %v1250_v48 }
 0x783   : > { %v1257_v49 = vmul.f32 %v1255_v39, %v1250_v48 }
 0x785   : > { %v1259_v50 = vmul.f32 %v1257_v49, %v1250_v48 }
 0x787   : > { %v1261_v51 = vadd.f32 %v1259_v50, %v1250_v48 }
 0x789   : > { %v1263_v2 = vmul.f32 0.7978846, %v1261_v51 }
 0x78b   : > { %1687 = vtanh.f32 %v1263_v2 }
 0x791   : > { %v1688_v52 = vpop.eup %1687 }
 0x792   : > { %v1267_v54 = vadd.f32 1.0, %v1688_v52 }
 0x794   : > { %v1269_v60 = vmul.f32 %v1267_v54, %v1253_v53 }
 0x796   : > { %1530 = vmatmul.msk.f32.gmra.mxu2 %vm1282_vm2, %v1269_v60 }
 0x7ea   : > { %v1306_v58 = vpop.f32.mrf.mxu2 }
 0x7eb   : > { %v1307_v63 = vadd.f32 %v1642_v61, %v1306_v58 }
 0x7ed   : > { %v1312_v3 = vadd.f32 %v1307_v63, %v2218_v32 }
 0x7ef   : > { %1314 = vst.msk [vmem:[#allocation2] sm:$0xff] %vm530_vm1, %v1312_v3 }
 0x7f0   : > { %1316 = vst.msk [vmem:[#allocation9] sm:$0xff] %vm530_vm1, %v1312_v3 }
 0x819   : > { %v1309_v5 = vpop.f32.mrf.mxu2 }
 0x81a   : > { %v1310_v6 = vadd.f32 %v1642_v61, %v1309_v5 }
 0x81c   : > { %v1313_v7 = vadd.f32 %v1310_v6, %v2227_v45 }
 0x81e   : > { %1315 = vst.msk [vmem:[#allocation2 + $0x8] sm:$0xff] %vm530_vm1, %v1313_v7 }
 0x81f   : > { %1317 = vst.msk [vmem:[#allocation9 + $0x8] sm:$0xff] %vm530_vm1, %v1313_v7 }
 0x820   : > { %1554 = dma.vmem_to_hbm [thread:$0]  (%p1573_p1), %s1324_s17, 256, %s1326_s1, [#allocation5], %s1866_s30, %s1866_s30, %s1867_s24  }
 0x821   : > { %1836 = dma.done.wait (%p1573_p1), [#allocation5], 256  }
 0x822   : > { %1838 = vsyncadd (%p1573_p1), [#allocation5], 4294967040 }
 0x823 PF: > { %p20_p3 = scmp.ge.s32.totalorder %s1965_s11, 4   ;;  %s2312_s13 = smov %s1845_s14 }
 0x824   : > { %s2313_s14 = smov %s1849_s15  ;;  %s2314_s15 = smov %s1977_s18 }
 0x825   : > { %s2315_s16 = smov %s1965_s11  ;;  %22 = sbr.rel (!%p20_p3) target bundleno = 9 (0x9), region = 129 }
 0x82a   :  { %1342 = vsyncpa [#allocation4], 1 }
 0x82b   :  { %1344 = vsyncpa [#allocation4 + $0x1], 1 }
 0x82c   :  { %1345 = vsyncpa [#allocation7], 1 }
 0x82d   :  { %1346 = vsyncpa [#allocation5], 1 }
 0x82e   :  { %1348 = vsyncpa [#allocation5 + $0x1], 1 }

</bundles_post_ra>
